<compile_context>
chip_gen: v6e
topology: v6e:2x2x1
jax: 0.10.0
libtpu: 0.0.40
codegen_flags: <defaults>
</compile_context>

<pallas_src>
import functools

import jax
import jax.numpy as jnp
from jax.experimental import pallas as pl
from jax.experimental.pallas import tpu as pltpu


def _recip(x):
    """Approx reciprocal (EUP slot) + one Newton step (VPU) ~ f32-accurate."""
    r = pl.reciprocal(x, approx=True)
    return r * (2.0 - x * r)


def _combined_loss_kernel(
    x_ref,       # (C, TR, 128) logits tile (source dtype, upcast after load)
    t_ref,       # (TR, 128)    class ids (int8/int16/int32, upcast after load)
    inter_ref,   # (C, 8, 128)  f32 per-batch partial: sum of probs * onehot
    psum_ref,    # (C, 8, 128)  f32 per-batch partial: sum of probs
    tsum_ref,    # (C, 8, 128)  f32 per-batch partial: sum of onehot
    focal_ref,   # (8, 128)     f32 per-batch partial: sum over classes of focal terms
    *,
    has_pad,
):
    p = pl.program_id(1)

    # New batch image => output blocks changed => re-init the resident accumulators.
    @pl.when(p == 0)
    def _init():
        inter_ref[...] = jnp.zeros_like(inter_ref)
        psum_ref[...] = jnp.zeros_like(psum_ref)
        tsum_ref[...] = jnp.zeros_like(tsum_ref)
        focal_ref[...] = jnp.zeros_like(focal_ref)

    C, TR, L = x_ref.shape
    G = TR // 8

    x = x_ref[...].astype(jnp.float32)     # upcast after the (possibly bf16) DMA
    t = t_ref[...].astype(jnp.int32)       # upcast after the (possibly int8) DMA

    cls = jax.lax.broadcasted_iota(jnp.int32, (C, TR, L), 0)
    onehot_b = cls == t[None, :, :]        # bool one-hot; float only where required
    onehot_f = onehot_b.astype(jnp.float32)

    # ---- softmax over the leading (non-vreg) class axis: VPU elementwise + EUP exp ----
    m = jnp.max(x, axis=0)
    e = jnp.exp(x - m[None])
    probs = e * _recip(jnp.sum(e, axis=0))[None]

    if has_pad:
        valid_f = (t >= 0).astype(jnp.float32)   # pad pixels carry the sentinel -1
        probs_for_card = probs * valid_f[None]
    else:
        probs_for_card = probs

    # Sublane-group fold (C,TR,128)->(C,8,128) with vreg-aligned static slices: pure
    # VPU adds (no XLU), so each accumulator read-modify-write is one vreg-row/class.
    def fold3(a):
        acc = a[:, 0:8, :]
        for g in range(1, G):
            acc = acc + a[:, g * 8:(g + 1) * 8, :]
        return acc

    def fold2(a):
        acc = a[0:8, :]
        for g in range(1, G):
            acc = acc + a[g * 8:(g + 1) * 8, :]
        return acc

    inter_ref[...] += fold3(jnp.where(onehot_b, probs, 0.0))
    psum_ref[...] += fold3(probs_for_card)
    tsum_ref[...] += fold3(onehot_f)

    # ---- per-class binary focal with logits (gamma = 2, alpha = None) ----
    z = jnp.exp(-jnp.abs(x))                                        # single EUP exp reused
    bce = jnp.maximum(x, 0.0) - jnp.where(onehot_b, x, 0.0) + jnp.log1p(z)
    # q = 1 - pt: z/(1+z) where sign(x) agrees with the binary target, else 1/(1+z).
    q = jnp.where(onehot_b == (x >= 0.0), z, 1.0) * _recip(1.0 + z)
    focal_sum = jnp.sum((q * q) * bce, axis=0)                      # (TR,128) C-way VPU adds
    if has_pad:
        focal_sum = focal_sum * valid_f
    focal_ref[...] += fold2(focal_sum)


def _pick_tile_rows(rows, bytes_per_row, budget_bytes=24 << 20, max_rows=512):
    """Largest multiple-of-8 divisor of `rows` whose working set fits the VMEM budget."""
    cap = min(max_rows, budget_bytes // max(bytes_per_row, 1), rows)
    cap = max(8, (cap // 8) * 8)
    cands = [d for d in range(8, cap + 1, 8) if rows % d == 0]
    return max(cands) if cands else 8


def combined_loss2(logits_nchw, targets_nhw, weight=0.5, eps=1e-7):
    """weight * focal + (1 - weight) * dice (smp multiclass defaults), one Pallas kernel."""
    N, C, H, W = logits_nchw.shape
    P = H * W

    # Free row-major reshape to (N, C, rows, 128); pad the pixel axis to a multiple of
    # 1024 (8 sublanes * 128 lanes) so every tile is full vregs. Pad pixels get the
    # target sentinel -1 and are masked out of the sums inside the kernel.
    P_pad = -(-P // 1024) * 1024
    pad = P_pad - P
    rows = P_pad // 128

    x = logits_nchw.reshape(N, C, P)
    t = targets_nhw.reshape(N, P)
    if t.dtype not in (jnp.int8, jnp.int16, jnp.int32):
        t = t.astype(jnp.int32)          # narrow signed int dtypes pass through (less DMA)
    if pad:
        x = jnp.pad(x, ((0, 0), (0, 0), (0, pad)))
        t = jnp.pad(t, ((0, 0), (0, pad)), constant_values=-1)
    x = x.reshape(N, C, rows, 128)
    t = t.reshape(N, rows, 128)

    # Tile sizing: account for double-buffered input tiles AND in-kernel f32 temps so
    # the same parameters stay safe inside v7x's 64 MiB VMEM (and v5e/v6e's 128 MiB).
    live_f32_temps = 6   # x, exp/probs, z, bce, q, focal terms (upper bound)
    bytes_per_row = (2 * (C * 128 * x.dtype.itemsize + 128 * t.dtype.itemsize)
                     + live_f32_temps * C * 128 * 4)
    tile_rows = _pick_tile_rows(rows, bytes_per_row)
    num_tiles = rows // tile_rows

    acc_bytes = (3 * C + 1) * 8 * 128 * 4
    vmem_limit = int(min(max(tile_rows * bytes_per_row + 2 * acc_bytes + (8 << 20),
                             16 << 20), 40 << 20))

    kernel = functools.partial(_combined_loss_kernel, has_pad=bool(pad))

    part = jax.ShapeDtypeStruct((N, C, 8, 128), jnp.float32)
    inter, psum, tsum, focal = pl.pallas_call(
        kernel,
        out_shape=(part, part, part, jax.ShapeDtypeStruct((N, 8, 128), jnp.float32)),
        grid_spec=pltpu.PrefetchScalarGridSpec(
            num_scalar_prefetch=0,
            grid=(N, num_tiles),
            in_specs=[
                # (batch squeezed, all classes, pixel-row tile, 128 lanes)
                # TODO(synk): add pipeline_mode=pl.Buffered(3) here if a profile shows
                # the C strided per-class sub-transfers leave the DMA exposed.
                pl.BlockSpec((None, C, tile_rows, 128), lambda n, p: (n, 0, p, 0)),
                pl.BlockSpec((None, tile_rows, 128), lambda n, p: (n, p, 0)),
            ],
            out_specs=[
                pl.BlockSpec((None, C, 8, 128), lambda n, p: (n, 0, 0, 0)),
                pl.BlockSpec((None, C, 8, 128), lambda n, p: (n, 0, 0, 0)),
                pl.BlockSpec((None, C, 8, 128), lambda n, p: (n, 0, 0, 0)),
                pl.BlockSpec((None, 8, 128), lambda n, p: (n, 0, 0)),
            ],
        ),
        compiler_params=pltpu.CompilerParams(
            # Batch axis "parallel": on v7x both TensorCores take disjoint images and
            # write disjoint per-batch partial blocks; the pixel axis is the reduction.
            dimension_semantics=("parallel", "arbitrary"),
            vmem_limit_bytes=vmem_limit,
        ),
    )(x, t)

    # ---- tiny finalize on the partials (wrapper-side, negligible XLA scalar work) ----
    inter_c = jnp.sum(inter, axis=(0, 2, 3))
    psum_c = jnp.sum(psum, axis=(0, 2, 3))
    tsum_c = jnp.sum(tsum, axis=(0, 2, 3))
    card = psum_c + tsum_c
    score = (2.0 * inter_c) / jnp.maximum(card, eps)        # smooth = 0
    present = (tsum_c > 0.0).astype(jnp.float32)
    dice = jnp.mean((1.0 - score) * present)                # mean over all C classes
    focal_loss = jnp.sum(focal) / (N * P)                   # per-class mean, summed over C
    return weight * focal_loss + (1.0 - weight) * dice


def _reference_loss(logits_nchw, targets_nhw, weight=0.5, gamma=2.0, eps=1e-7):
    """Pure-JAX reference mirroring smp Dice + Focal (multiclass) default semantics."""
    N, C, H, W = logits_nchw.shape
    x = logits_nchw.astype(jnp.float32)
    onehot = jax.nn.one_hot(targets_nhw, C, dtype=jnp.float32)        # (N,H,W,C)
    onehot = jnp.transpose(onehot, (0, 3, 1, 2))                      # (N,C,H,W)

    # Dice
    probs = jax.nn.softmax(x, axis=1)
    dims = (0, 2, 3)
    inter = jnp.sum(probs * onehot, axis=dims)
    card = jnp.sum(probs + onehot, axis=dims)
    score = (2.0 * inter) / jnp.maximum(card, eps)
    mask = (jnp.sum(onehot, axis=dims) > 0).astype(jnp.float32)
    dice = jnp.mean((1.0 - score) * mask)

    # Focal
    bce = jnp.maximum(x, 0.0) - x * onehot + jnp.log1p(jnp.exp(-jnp.abs(x)))
    pt = jnp.exp(-bce)
    focal_elem = ((1.0 - pt) ** gamma) * bce
    focal = jnp.sum(jnp.mean(focal_elem, axis=(0, 2, 3)))             # sum over classes

    return weight * focal + (1.0 - weight) * dice


if __name__ == "__main__":
    key = jax.random.PRNGKey(0)
    k_logits, k_targets = jax.random.split(key)

    N, C, H, W = 2, 4, 16, 16
    logits = jax.random.normal(k_logits, (N, C, H, W), dtype=jnp.float32)
    targets = jax.random.randint(k_targets, (N, H, W), 0, C, dtype=jnp.int32)

    loss = combined_loss2(logits, targets, weight=0.5)
    loss = jax.block_until_ready(loss)

    ref = _reference_loss(logits, targets, weight=0.5)
    # approx-reciprocal (+Newton) and different summation order => slightly looser tol
    assert jnp.allclose(loss, ref, rtol=5e-4, atol=1e-5), (loss, ref)

    print("KERNEL_OK")
</pallas_src>

<mosaic_0001>
module attributes {stable_mosaic.version = 11 : i64} {
  func.func @_combined_loss_kernel(%arg0: i32, %arg1: i32, %arg2: memref<1x4x8x128xf32, #tpu.memory_space<vmem>>, %arg3: memref<1x8x128xi32, #tpu.memory_space<vmem>>, %arg4: memref<1x4x8x128xf32, #tpu.memory_space<vmem>>, %arg5: memref<1x4x8x128xf32, #tpu.memory_space<vmem>>, %arg6: memref<1x4x8x128xf32, #tpu.memory_space<vmem>>, %arg7: memref<1x8x128xf32, #tpu.memory_space<vmem>>) attributes {dimension_semantics = [#tpu.dimension_semantics<parallel>, #tpu.dimension_semantics<arbitrary>], iteration_bounds = array<i64: 2, 1>, scalar_prefetch = 0 : i64, scratch_operands = 0 : i64, tpu.core_type = #tpu.core_type<tc>, window_params = [{transform_indices = @transform_0, window_bounds = array<i64: 1, 4, 8, 128>}, {transform_indices = @transform_1, window_bounds = array<i64: 1, 8, 128>}, {transform_indices = @transform_2, window_bounds = array<i64: 1, 4, 8, 128>}, {transform_indices = @transform_3, window_bounds = array<i64: 1, 4, 8, 128>}, {transform_indices = @transform_4, window_bounds = array<i64: 1, 4, 8, 128>}, {transform_indices = @transform_5, window_bounds = array<i64: 1, 8, 128>}]} {
    %c0_i32 = arith.constant 0 : i32
    %0 = arith.cmpi eq, %arg1, %c0_i32 : i32
    %1 = arith.extui %0 : i1 to i32
    %c0_i32_0 = arith.constant 0 : i32
    %2 = arith.cmpi ne, %1, %c0_i32_0 : i32
    scf.if %2 {
      %cst_50 = arith.constant 0.000000e+00 : f32
      %89 = vector.broadcast %cst_50 : f32 to vector<4x8x128xf32>
      %c0_51 = arith.constant 0 : index
      %c0_52 = arith.constant 0 : index
      %c0_53 = arith.constant 0 : index
      %c0_54 = arith.constant 0 : index
      %90 = vector.load %arg4[%c0_51, %c0_52, %c0_53, %c0_54] : memref<1x4x8x128xf32, #tpu.memory_space<vmem>>, vector<1x4x8x128xf32>
      %91 = vector.shape_cast %90 : vector<1x4x8x128xf32> to vector<4x8x128xf32>
      %92 = vector.shape_cast %89 : vector<4x8x128xf32> to vector<1x4x8x128xf32>
      tpu.vector_store %arg4[%c0_51, %c0_52, %c0_53, %c0_54], %92 {strides = array<i32>} : memref<1x4x8x128xf32, #tpu.memory_space<vmem>>, vector<1x4x8x128xf32>,
      %cst_55 = arith.constant 0.000000e+00 : f32
      %93 = vector.broadcast %cst_55 : f32 to vector<4x8x128xf32>
      %c0_56 = arith.constant 0 : index
      %c0_57 = arith.constant 0 : index
      %c0_58 = arith.constant 0 : index
      %c0_59 = arith.constant 0 : index
      %94 = vector.load %arg5[%c0_56, %c0_57, %c0_58, %c0_59] : memref<1x4x8x128xf32, #tpu.memory_space<vmem>>, vector<1x4x8x128xf32>
      %95 = vector.shape_cast %94 : vector<1x4x8x128xf32> to vector<4x8x128xf32>
      %96 = vector.shape_cast %93 : vector<4x8x128xf32> to vector<1x4x8x128xf32>
      tpu.vector_store %arg5[%c0_56, %c0_57, %c0_58, %c0_59], %96 {strides = array<i32>} : memref<1x4x8x128xf32, #tpu.memory_space<vmem>>, vector<1x4x8x128xf32>,
      %cst_60 = arith.constant 0.000000e+00 : f32
      %97 = vector.broadcast %cst_60 : f32 to vector<4x8x128xf32>
      %c0_61 = arith.constant 0 : index
      %c0_62 = arith.constant 0 : index
      %c0_63 = arith.constant 0 : index
      %c0_64 = arith.constant 0 : index
      %98 = vector.load %arg6[%c0_61, %c0_62, %c0_63, %c0_64] : memref<1x4x8x128xf32, #tpu.memory_space<vmem>>, vector<1x4x8x128xf32>
      %99 = vector.shape_cast %98 : vector<1x4x8x128xf32> to vector<4x8x128xf32>
      %100 = vector.shape_cast %97 : vector<4x8x128xf32> to vector<1x4x8x128xf32>
      tpu.vector_store %arg6[%c0_61, %c0_62, %c0_63, %c0_64], %100 {strides = array<i32>} : memref<1x4x8x128xf32, #tpu.memory_space<vmem>>, vector<1x4x8x128xf32>,
      %cst_65 = arith.constant 0.000000e+00 : f32
      %101 = vector.broadcast %cst_65 : f32 to vector<8x128xf32>
      %c0_66 = arith.constant 0 : index
      %c0_67 = arith.constant 0 : index
      %c0_68 = arith.constant 0 : index
      %102 = vector.load %arg7[%c0_66, %c0_67, %c0_68] : memref<1x8x128xf32, #tpu.memory_space<vmem>>, vector<1x8x128xf32>
      %103 = vector.shape_cast %102 : vector<1x8x128xf32> to vector<8x128xf32>
      %104 = vector.shape_cast %101 : vector<8x128xf32> to vector<1x8x128xf32>
      tpu.vector_store %arg7[%c0_66, %c0_67, %c0_68], %104 {strides = array<i32>} : memref<1x8x128xf32, #tpu.memory_space<vmem>>, vector<1x8x128xf32>,
    } else {
    }
    %c0 = arith.constant 0 : index
    %c0_1 = arith.constant 0 : index
    %c0_2 = arith.constant 0 : index
    %c0_3 = arith.constant 0 : index
    %3 = vector.load %arg2[%c0, %c0_1, %c0_2, %c0_3] : memref<1x4x8x128xf32, #tpu.memory_space<vmem>>, vector<1x4x8x128xf32>
    %4 = vector.shape_cast %3 : vector<1x4x8x128xf32> to vector<4x8x128xf32>
    %c0_4 = arith.constant 0 : index
    %c0_5 = arith.constant 0 : index
    %c0_6 = arith.constant 0 : index
    %5 = vector.load %arg3[%c0_4, %c0_5, %c0_6] : memref<1x8x128xi32, #tpu.memory_space<vmem>>, vector<1x8x128xi32>
    %6 = vector.shape_cast %5 : vector<1x8x128xi32> to vector<8x128xi32>
    %7 = tpu.iota {dimensions = array<i32: 0>} : vector<4x8x128xi32>
    %8 = vector.shape_cast %6 : vector<8x128xi32> to vector<1x8x128xi32>
    %9 = vector.broadcast %8 : vector<1x8x128xi32> to vector<4x8x128xi32>
    %10 = arith.cmpi eq, %7, %9 : vector<4x8x128xi32>
    %11 = arith.extui %10 : vector<4x8x128xi1> to vector<4x8x128xi32>
    %12 = arith.sitofp %11 : vector<4x8x128xi32> to vector<4x8x128xf32>
    %cst = arith.constant dense<0xFF800000> : vector<8x128xf32>
    %13 = vector.multi_reduction <maximumf>, %4, %cst [0] : vector<4x8x128xf32> to vector<8x128xf32>
    %14 = vector.shape_cast %13 : vector<8x128xf32> to vector<1x8x128xf32>
    %15 = vector.broadcast %14 : vector<1x8x128xf32> to vector<4x8x128xf32>
    %16 = arith.subf %4, %15 : vector<4x8x128xf32>
    %17 = math.exp %16 : vector<4x8x128xf32>
    %cst_7 = arith.constant dense<0.000000e+00> : vector<8x128xf32>
    %18 = vector.multi_reduction <add>, %17, %cst_7 [0] : vector<4x8x128xf32> to vector<8x128xf32>
    %19 = tpu.reciprocal %18 {approx = true} : vector<8x128xf32> -> vector<8x128xf32>
    %20 = arith.mulf %18, %19 : vector<8x128xf32>
    %cst_8 = arith.constant 2.000000e+00 : f32
    %21 = vector.broadcast %cst_8 : f32 to vector<8x128xf32>
    %22 = arith.subf %21, %20 : vector<8x128xf32>
    %23 = arith.mulf %19, %22 : vector<8x128xf32>
    %24 = vector.shape_cast %23 : vector<8x128xf32> to vector<1x8x128xf32>
    %25 = vector.broadcast %24 : vector<1x8x128xf32> to vector<4x8x128xf32>
    %26 = arith.mulf %17, %25 : vector<4x8x128xf32>
    %c0_i32_9 = arith.constant 0 : i32
    %27 = vector.broadcast %c0_i32_9 : i32 to vector<8x128xi32>
    %28 = arith.cmpi sge, %6, %27 : vector<8x128xi32>
    %29 = arith.extui %28 : vector<8x128xi1> to vector<8x128xi32>
    %30 = arith.sitofp %29 : vector<8x128xi32> to vector<8x128xf32>
    %31 = vector.shape_cast %30 : vector<8x128xf32> to vector<1x8x128xf32>
    %32 = vector.broadcast %31 : vector<1x8x128xf32> to vector<4x8x128xf32>
    %33 = arith.mulf %26, %32 : vector<4x8x128xf32>
    %c0_10 = arith.constant 0 : index
    %c0_11 = arith.constant 0 : index
    %c0_12 = arith.constant 0 : index
    %c0_13 = arith.constant 0 : index
    %34 = vector.load %arg4[%c0_10, %c0_11, %c0_12, %c0_13] : memref<1x4x8x128xf32, #tpu.memory_space<vmem>>, vector<1x4x8x128xf32>
    %35 = vector.shape_cast %34 : vector<1x4x8x128xf32> to vector<4x8x128xf32>
    %cst_14 = arith.constant 0.000000e+00 : f32
    %36 = vector.broadcast %cst_14 : f32 to vector<4x8x128xf32>
    %37 = arith.select %10, %26, %36 : vector<4x8x128xi1>, vector<4x8x128xf32>
    %38 = arith.addf %35, %37 : vector<4x8x128xf32>
    %c0_15 = arith.constant 0 : index
    %c0_16 = arith.constant 0 : index
    %c0_17 = arith.constant 0 : index
    %c0_18 = arith.constant 0 : index
    %39 = vector.load %arg4[%c0_15, %c0_16, %c0_17, %c0_18] : memref<1x4x8x128xf32, #tpu.memory_space<vmem>>, vector<1x4x8x128xf32>
    %40 = vector.shape_cast %39 : vector<1x4x8x128xf32> to vector<4x8x128xf32>
    %41 = vector.shape_cast %38 : vector<4x8x128xf32> to vector<1x4x8x128xf32>
    tpu.vector_store %arg4[%c0_15, %c0_16, %c0_17, %c0_18], %41 {strides = array<i32>} : memref<1x4x8x128xf32, #tpu.memory_space<vmem>>, vector<1x4x8x128xf32>,
    %c0_19 = arith.constant 0 : index
    %c0_20 = arith.constant 0 : index
    %c0_21 = arith.constant 0 : index
    %c0_22 = arith.constant 0 : index
    %42 = vector.load %arg5[%c0_19, %c0_20, %c0_21, %c0_22] : memref<1x4x8x128xf32, #tpu.memory_space<vmem>>, vector<1x4x8x128xf32>
    %43 = vector.shape_cast %42 : vector<1x4x8x128xf32> to vector<4x8x128xf32>
    %44 = arith.addf %43, %33 : vector<4x8x128xf32>
    %c0_23 = arith.constant 0 : index
    %c0_24 = arith.constant 0 : index
    %c0_25 = arith.constant 0 : index
    %c0_26 = arith.constant 0 : index
    %45 = vector.load %arg5[%c0_23, %c0_24, %c0_25, %c0_26] : memref<1x4x8x128xf32, #tpu.memory_space<vmem>>, vector<1x4x8x128xf32>
    %46 = vector.shape_cast %45 : vector<1x4x8x128xf32> to vector<4x8x128xf32>
    %47 = vector.shape_cast %44 : vector<4x8x128xf32> to vector<1x4x8x128xf32>
    tpu.vector_store %arg5[%c0_23, %c0_24, %c0_25, %c0_26], %47 {strides = array<i32>} : memref<1x4x8x128xf32, #tpu.memory_space<vmem>>, vector<1x4x8x128xf32>,
    %c0_27 = arith.constant 0 : index
    %c0_28 = arith.constant 0 : index
    %c0_29 = arith.constant 0 : index
    %c0_30 = arith.constant 0 : index
    %48 = vector.load %arg6[%c0_27, %c0_28, %c0_29, %c0_30] : memref<1x4x8x128xf32, #tpu.memory_space<vmem>>, vector<1x4x8x128xf32>
    %49 = vector.shape_cast %48 : vector<1x4x8x128xf32> to vector<4x8x128xf32>
    %50 = arith.addf %49, %12 : vector<4x8x128xf32>
    %c0_31 = arith.constant 0 : index
    %c0_32 = arith.constant 0 : index
    %c0_33 = arith.constant 0 : index
    %c0_34 = arith.constant 0 : index
    %51 = vector.load %arg6[%c0_31, %c0_32, %c0_33, %c0_34] : memref<1x4x8x128xf32, #tpu.memory_space<vmem>>, vector<1x4x8x128xf32>
    %52 = vector.shape_cast %51 : vector<1x4x8x128xf32> to vector<4x8x128xf32>
    %53 = vector.shape_cast %50 : vector<4x8x128xf32> to vector<1x4x8x128xf32>
    tpu.vector_store %arg6[%c0_31, %c0_32, %c0_33, %c0_34], %53 {strides = array<i32>} : memref<1x4x8x128xf32, #tpu.memory_space<vmem>>, vector<1x4x8x128xf32>,
    %54 = math.absf %4 : vector<4x8x128xf32>
    %cst_35 = arith.constant 0.000000e+00 : f32
    %55 = vector.broadcast %cst_35 : f32 to vector<4x8x128xf32>
    %56 = arith.subf %55, %54 : vector<4x8x128xf32>
    %57 = math.exp %56 : vector<4x8x128xf32>
    %cst_36 = arith.constant 0.000000e+00 : f32
    %58 = vector.broadcast %cst_36 : f32 to vector<4x8x128xf32>
    %59 = arith.maximumf %4, %58 : vector<4x8x128xf32>
    %cst_37 = arith.constant 0.000000e+00 : f32
    %60 = vector.broadcast %cst_37 : f32 to vector<4x8x128xf32>
    %61 = arith.select %10, %4, %60 : vector<4x8x128xi1>, vector<4x8x128xf32>
    %62 = arith.subf %59, %61 : vector<4x8x128xf32>
    %63 = math.log1p %57 : vector<4x8x128xf32>
    %64 = arith.addf %62, %63 : vector<4x8x128xf32>
    %cst_38 = arith.constant 0.000000e+00 : f32
    %65 = vector.broadcast %cst_38 : f32 to vector<4x8x128xf32>
    %66 = arith.cmpf oge, %4, %65 : vector<4x8x128xf32>
    %67 = arith.xori %10, %66 : vector<4x8x128xi1>
    %cst_39 = arith.constant dense<true> : vector<4x8x128xi1>
    %68 = arith.xori %67, %cst_39 : vector<4x8x128xi1>
    %cst_40 = arith.constant 1.000000e+00 : f32
    %69 = vector.broadcast %cst_40 : f32 to vector<4x8x128xf32>
    %70 = arith.select %68, %57, %69 : vector<4x8x128xi1>, vector<4x8x128xf32>
    %cst_41 = arith.constant 1.000000e+00 : f32
    %71 = vector.broadcast %cst_41 : f32 to vector<4x8x128xf32>
    %72 = arith.addf %71, %57 : vector<4x8x128xf32>
    %73 = tpu.reciprocal %72 {approx = true} : vector<4x8x128xf32> -> vector<4x8x128xf32>
    %74 = arith.mulf %72, %73 : vector<4x8x128xf32>
    %cst_42 = arith.constant 2.000000e+00 : f32
    %75 = vector.broadcast %cst_42 : f32 to vector<4x8x128xf32>
    %76 = arith.subf %75, %74 : vector<4x8x128xf32>
    %77 = arith.mulf %73, %76 : vector<4x8x128xf32>
    %78 = arith.mulf %70, %77 : vector<4x8x128xf32>
    %79 = arith.mulf %78, %78 : vector<4x8x128xf32>
    %80 = arith.mulf %79, %64 : vector<4x8x128xf32>
    %cst_43 = arith.constant dense<0.000000e+00> : vector<8x128xf32>
    %81 = vector.multi_reduction <add>, %80, %cst_43 [0] : vector<4x8x128xf32> to vector<8x128xf32>
    %82 = arith.mulf %81, %30 : vector<8x128xf32>
    %c0_44 = arith.constant 0 : index
    %c0_45 = arith.constant 0 : index
    %c0_46 = arith.constant 0 : index
    %83 = vector.load %arg7[%c0_44, %c0_45, %c0_46] : memref<1x8x128xf32, #tpu.memory_space<vmem>>, vector<1x8x128xf32>
    %84 = vector.shape_cast %83 : vector<1x8x128xf32> to vector<8x128xf32>
    %85 = arith.addf %84, %82 : vector<8x128xf32>
    %c0_47 = arith.constant 0 : index
    %c0_48 = arith.constant 0 : index
    %c0_49 = arith.constant 0 : index
    %86 = vector.load %arg7[%c0_47, %c0_48, %c0_49] : memref<1x8x128xf32, #tpu.memory_space<vmem>>, vector<1x8x128xf32>
    %87 = vector.shape_cast %86 : vector<1x8x128xf32> to vector<8x128xf32>
    %88 = vector.shape_cast %85 : vector<8x128xf32> to vector<1x8x128xf32>
    tpu.vector_store %arg7[%c0_47, %c0_48, %c0_49], %88 {strides = array<i32>} : memref<1x8x128xf32, #tpu.memory_space<vmem>>, vector<1x8x128xf32>,
    return
  }
  func.func @transform_0(%arg0: i32, %arg1: i32) -> (i32, i32, i32, i32) {
    %c0_i32 = arith.constant 0 : i32
    %c0_i32_0 = arith.constant 0 : i32
    %c0_i32_1 = arith.constant 0 : i32
    return %arg0, %c0_i32, %arg1, %c0_i32_0 : i32, i32, i32, i32
  }
  func.func @transform_1(%arg0: i32, %arg1: i32) -> (i32, i32, i32) {
    %c0_i32 = arith.constant 0 : i32
    %c0_i32_0 = arith.constant 0 : i32
    return %arg0, %arg1, %c0_i32 : i32, i32, i32
  }
  func.func @transform_2(%arg0: i32, %arg1: i32) -> (i32, i32, i32, i32) {
    %c0_i32 = arith.constant 0 : i32
    %c0_i32_0 = arith.constant 0 : i32
    %c0_i32_1 = arith.constant 0 : i32
    %c0_i32_2 = arith.constant 0 : i32
    return %arg0, %c0_i32, %c0_i32_0, %c0_i32_1 : i32, i32, i32, i32
  }
  func.func @transform_3(%arg0: i32, %arg1: i32) -> (i32, i32, i32, i32) {
    %c0_i32 = arith.constant 0 : i32
    %c0_i32_0 = arith.constant 0 : i32
    %c0_i32_1 = arith.constant 0 : i32
    %c0_i32_2 = arith.constant 0 : i32
    return %arg0, %c0_i32, %c0_i32_0, %c0_i32_1 : i32, i32, i32, i32
  }
  func.func @transform_4(%arg0: i32, %arg1: i32) -> (i32, i32, i32, i32) {
    %c0_i32 = arith.constant 0 : i32
    %c0_i32_0 = arith.constant 0 : i32
    %c0_i32_1 = arith.constant 0 : i32
    %c0_i32_2 = arith.constant 0 : i32
    return %arg0, %c0_i32, %c0_i32_0, %c0_i32_1 : i32, i32, i32, i32
  }
  func.func @transform_5(%arg0: i32, %arg1: i32) -> (i32, i32, i32) {
    %c0_i32 = arith.constant 0 : i32
    %c0_i32_0 = arith.constant 0 : i32
    %c0_i32_1 = arith.constant 0 : i32
    return %arg0, %c0_i32, %c0_i32_0 : i32, i32, i32
  }
}

</mosaic_0001>

<bundles_post_ra>
// kernel: tpu_custom_call.1
= control target key start
LH: loop header
LB: loop body
LE: loop exit
PB: predicated region body
PF: predicated region fallthrough
CT: control target
= control target key end

     0   :  { %s1770_s0 = inlined_call_operand.hbm [shape: f32[2,4,8,128], index: 0, kind: input, shape index: {}]   ;;  %s1771_s1 = inlined_call_operand.hbm [shape: s32[2,8,128], index: 1, kind: input, shape index: {}]   ;;  %s1772_s2 = inlined_call_operand.hbm [shape: f32[2,4,8,128], index: 2, kind: output, shape index: {0}]   ;;  %s1773_s3 = inlined_call_operand.hbm [shape: f32[2,4,8,128], index: 3, kind: output, shape index: {1}]   ;;  %s1774_s4 = inlined_call_operand.hbm [shape: f32[2,4,8,128], index: 4, kind: output, shape index: {2}]   ;;  %s1775_s5 = inlined_call_operand.hbm [shape: f32[2,8,128], index: 5, kind: output, shape index: {3}]  }
   0x1   :  { %1779 = sst [smem:[#allocation21_spill]] %s1770_s0 }
   0x2   :  { %11 = vsyncpa [#allocation3], 0 }
   0x3   :  { %13 = vsyncpa [#allocation3 + $0x1], 0 }
   0x4   :  { %14 = vsyncpa [#allocation6], 0 }
   0x5   :  { %16 = vsyncpa [#allocation6 + $0x1], 0 }
   0x6   :  { %17 = vsyncpa [#allocation4], 0 }
   0x7   :  { %19 = vsyncpa [#allocation4 + $0x1], 0 }
   0x8   :  { %20 = vsyncpa [#allocation9], 0 }
   0x9   :  { %22 = vsyncpa [#allocation9 + $0x1], 0 }
   0xa   :  { %23 = vsyncpa [#allocation12], 0 }
   0xb   :  { %25 = vsyncpa [#allocation12 + $0x1], 0  ;;  %s1260_s18 = smov 0   ;;  %s1262_s19 = smov 0  }
   0xc   :  { %s1264_s20 = smov 0   ;;  %s1266_s21 = smov 0  }
   0xd   :  { %s1268_s22 = smov 0   ;;  %s1270_s23 = smov 0  }
   0xe LB: > { %1780 = sst [smem:[#allocation18_spill]] %s1204_s20  ;;  %s1291_s24 = sadd.s32 4294967295, %s1216_s23   ;;  %s1216_s23 = sphi %s1270_s23, %s31_s23   ;;  %s1212_s22 = sphi %s1268_s22, %s1822_s22   ;;  %s1208_s21 = sphi %s1266_s21, %s1821_s21   ;;  %s1204_s20 = sphi %s1264_s20, %s1817_s20   ;;  %s1200_s19 = sphi %s1262_s19, %s1820_s19   ;;  %s1196_s18 = sphi %s1260_s18, %s1819_s18  }
   0xf   : > { %s1776_s25 = sadd.s32 4294967294, %s1216_s23   ;;  %s43_s26 = sadd.s32 1, %s1212_s22 }
  0x10   : > { %s52_s27 = sadd.s32 1, %s1204_s20  ;;  %p45_p0 = scmp.ge.s32.totalorder %s43_s26, 2 }
  0x11   : > { %p59_p1 = scmp.ne.s32.totalorder %s1204_s20, %s1200_s19  ;;  %p60_p2 = scmp.eq.s32.totalorder %s1216_s23, 0 }
  0x12   : > { %p65_p3 = scmp.ne.s32.totalorder %s1200_s19, %s1196_s18  ;;  %s1824_s26 = smov (%p45_p0, %s43_s26), 0 }
  0x13   : > { %1781 = sst [smem:[#allocation19_spill]] %s1824_s26  ;;  %p1303_p4 = por %p60_p2, %p59_p1 }
  0x14   : > { %p66_p5 = scmp.eq.s32.totalorder %s1291_s24, 0  ;;  %s47_s29 = ssub.s32 %s1212_s22, %s1824_s26 }
  0x15   : > { %p117_p6 = scmp.eq.s32.totalorder %s1291_s24, 1  ;;  %p50_p7 = scmp.eq.s32.totalorder %s47_s29, 0 }
  0x16   : > { %p1311_p8 = por %p66_p5, %p65_p3  ;;  %p123_p10 = scmp.eq.s32.totalorder %s1776_s25, 1 }
  0x17   : > { %p1315_p9 = por %p117_p6, %p59_p1  ;;  %p900_p13 = scmp.lt.s32.totalorder %s1216_s23, 2 }
  0x18   : > { %s1322_s7 = scalar_select %p50_p7, %s1204_s20, %s52_s27  }
  0x19   : > { %p1324_p11 = por %p123_p10, %p65_p3  ;;  %s1331_s9 = sand.u32 1, %s1204_s20  }
  0x1a   : > { %1785 = sst [smem:[#allocation20_spill]] %s1322_s7  ;;  %s834_s10 = sshll.u32 %s1331_s9, 5 }
  0x1b   : > { %s864_s11 = sshll.u32 %s1212_s22, 9  ;;  %s1787_s0 = sld [smem:[#allocation21_spill]] }
  0x1c   : > { %s225_s15 = scalar_lea.vmem [#allocation2], %s834_s10  ;;  %p1340_p0 = pnand %p900_p13, %p1303_p4 }
  0x1d   : > { %s233_s16 = sshll.u32 %s225_s15, 4  ;;  %p839_p1 = scmp.ge.s32.totalorder %s1216_s23, 1  ;;  %s234_s16 = int_to_ptr.vmem [resolvable:$true] %s233_s16 }
  0x1e   : > { %s222_s27 = scalar_lea.sflag [#allocation3], %s1331_s9  ;;  %p992_p2 = pneg %p1340_p0 }
  0x1f   : > { %s1003_s29 = scalar_lea.vmem %s234_s16, 512  ;;  %s1218_s10 = smov [#allocation2]  }
  0x20   : > { %p1004_p3 = scmp.ne.s32.totalorder %s234_s16, %s1003_s29 }
  0x21   : > { %s232_s14 = scalar_lea.hbm %s1787_s0, %s864_s11  ;;  %s1008_s11 = sshll.u32 %s1218_s10, 4  ;;  %s1009_s11 = int_to_ptr.vmem [resolvable:$false] %s1008_s11 }
  0x22   : > { %p1006_p5 = pnand %p1004_p3, %p992_p2  ;;  %s1010_s28 = scalar_lea.vmem %s1009_s11, 1024 }
  0x23   : > { %p1011_p4 = scmp.lt.s32.totalorder %s234_s16, %s1009_s11  ;;  %p1012_p7 = scmp.lt.s32.totalorder %s1010_s28, %s1003_s29 }
  0x24   : > { %p1007_p6 = pneg %p1006_p5 }
  0x25   : > { %p1013_p10 = por %p1012_p7, %p1011_p4 }
  0x27   : > { %p1014_p13 = pnand %p1013_p10, %p1007_p6 }
  0x29   : > { %1017 = shalt.err (!%p1014_p13)
}
  0x2a   : > { %s1219_s12 = smov 128   ;;  %s1220_s13 = smov 8  }
  0x2b   : > { %883 = dma.hbm_to_vmem [thread:$0]  (!%p1340_p0), %s232_s14, 512, %s234_s16, %s222_s27, %s1219_s12, %s1219_s12, %s1220_s13  }
  0x2c   : > { %p260_p3 = scmp.lt.s32.totalorder %s1216_s23, 3  ;;  %s837_s15 = sshll.u32 %s1331_s9, 3 }
  0x2d   : > { %s838_s10 = sshll.u32 %s1212_s22, 7  ;;  %s247_s0 = scalar_lea.vmem [#allocation5], %s837_s15 }
  0x2e   : > { %p1358_p5 = pnand %p839_p1, %p260_p3  ;;  %s253_s25 = scalar_lea.hbm %s1771_s1, %s838_s10 }
  0x2f   : > { %s255_s26 = sshll.u32 %s247_s0, 4  ;;  %s244_s7 = scalar_lea.sflag [#allocation6], %s1331_s9  ;;  %s256_s26 = int_to_ptr.vmem [resolvable:$true] %s255_s26 }
  0x30   : > { %s1031_s20 = scalar_lea.vmem %s256_s26, 128  ;;  %s1221_s14 = smov [#allocation5]  }
  0x31   : > { %p1032_p6 = scmp.ne.s32.totalorder %s256_s26, %s1031_s20  ;;  %s1036_s16 = sshll.u32 %s1221_s14, 4  ;;  %s1037_s16 = int_to_ptr.vmem [resolvable:$false] %s1036_s16 }
  0x32   : > { %s1038_s27 = scalar_lea.vmem %s1037_s16, 256  ;;  %p1039_p1 = scmp.lt.s32.totalorder %s256_s26, %s1037_s16 }
  0x33   : > { %p1034_p4 = pnand %p1032_p6, %p992_p2  ;;  %p1040_p10 = scmp.lt.s32.totalorder %s1038_s27, %s1031_s20 }
  0x35   : > { %p1035_p7 = pneg %p1034_p4  ;;  %p1041_p13 = por %p1040_p10, %p1039_p1 }
  0x37   : > { %p1042_p3 = pnand %p1041_p13, %p1035_p7 }
  0x39   : > { %1045 = shalt.err (!%p1042_p3)
}
  0x3a   : > { %886 = dma.hbm_to_vmem [thread:$0]  (!%p1340_p0), %s253_s25, 128, %s256_s26, %s244_s7  }
  0x3b   : > { %264 = sbr.rel (%p1358_p5) target bundleno = 213 (0xd5), region = 28  ;;  %s1374_s0 = sand.u32 (!%p1358_p5), 1, %s1200_s19  }
  0x3c   : > { %s1377_s9 = sshll.u32 (!%p1358_p5), %s1374_s0, 5  ;;  %s267_s12 = scalar_lea.sflag (!%p1358_p5), [#allocation3], %s1374_s0 }
  0x3d   : > { %s270_s20 = scalar_lea.vmem (!%p1358_p5), [#allocation2], %s1377_s9 }
  0x40   : > { %1175 = dma.done.wait (%p1311_p8), %s267_s12, 512  }
  0x41   : > { %1177 = vsyncadd (%p1311_p8), %s267_s12, 4294966784  ;;  %s841_s25 = sshll.u32 %s1374_s0, 3  ;;  %s276_s26 = scalar_lea.sflag [#allocation6], %s1374_s0 }
  0x42   : > { %s279_s7 = scalar_lea.vmem [#allocation5], %s841_s25 }
  0x43   : > { %1179 = dma.done.wait (%p1311_p8), %s276_s26, 128  }
  0x44   : > { %1181 = vsyncadd (%p1311_p8), %s276_s26, 4294967168  ;;  %v1393_v0 = vld [vmem:[%s270_s20] sm:$0xff]  ;;  %v1395_v1 = vld [vmem:[%s270_s20 + $0x8] sm:$0xff]  ;;  %v1222_v28 = vmov 0.0   ;;  %s1432_s30 = scalar_lea.vmem [#allocation10], %s1377_s9  ;;  %vm1223_vm10 = vmmov 1  }
  0x45   : > { %v1397_v2 = vld [vmem:[%s270_s20 + $0x10] sm:$0xff]  ;;  %v1399_v3 = vld [vmem:[%s270_s20 + $0x18] sm:$0xff]  ;;  %v360_v4 = vmax.f32 %v1393_v0, %v1395_v1  ;;  %v433_v5 = vand.u32 2147483647, %v1393_v0  ;;  %v434_v6 = vand.u32 2147483647, %v1395_v1 }
  0x46   : > { %v361_v7 = vmax.f32 %v1397_v2, %v1399_v3  ;;  %v435_v8 = vand.u32 2147483647, %v1397_v2  ;;  %v436_v9 = vand.u32 2147483647, %v1399_v3  ;;  %v1413_v25 = vld [vmem:[%s279_s7] sm:$0xff]  ;;  %v449_v50 = vmax.f32 %v1393_v0, 0.0 }
  0x47   : > { %v437_v10 = vsub.f32 0.0, %v433_v5  ;;  %v438_v11 = vsub.f32 0.0, %v434_v6  ;;  %vm348_vm0 = vcmp.eq.s32.totalorder %v1413_v25, 0  ;;  %vm349_vm1 = vcmp.eq.s32.totalorder %v1413_v25, 1  ;;  %s561_s17 = sand.u32 1, %s1291_s24   ;;  %s865_s13 = sshll.u32 %s1208_s21, 9 }
  0x48   : > { %v362_v12 = vmax.f32 %v360_v4, %v361_v7  ;;  %v439_v13 = vsub.f32 0.0, %v435_v8  ;;  %v440_v14 = vsub.f32 0.0, %v436_v9  ;;  %vm350_vm2 = vcmp.eq.s32.totalorder %v1413_v25, 2  ;;  %s311_s15 = scalar_lea.vmem [#allocation8], %s1377_s9  ;;  %s304_s29 = scalar_lea.vmem [#allocation7], %s1377_s9 }
  0x49   : > { %v441_v15 = vmul.f32 1.442695, %v437_v10  ;;  %v443_v16 = vmul.f32 1.442695, %v438_v11  ;;  %vm351_vm3 = vcmp.eq.s32.totalorder %v1413_v25, 3  ;;  %v846_v29 = vsel %vm348_vm0, 1.0, %v1222_v28  ;;  %s1630_s16 = scalar_lea.hbm %s1773_s3, %s865_s13  ;;  %s1638_s20 = scalar_lea.hbm %s1772_s2, %s865_s13 }
  0x4a   : > { %v363_v17 = vsub.f32 %v1393_v0, %v362_v12  ;;  %v364_v18 = vsub.f32 %v1395_v1, %v362_v12  ;;  %v365_v19 = vsub.f32 %v1397_v2, %v362_v12  ;;  %v366_v20 = vsub.f32 %v1399_v3, %v362_v12  ;;  %429 = vst [vmem:[%s1432_s30] sm:$0xff] %v846_v29  ;;  %s601_s10 = sshll.u32 %s311_s15, 4  ;;  %s585_s11 = sshll.u32 %s304_s29, 4  ;;  %s1633_s10 = int_to_ptr.vmem [resolvable:$true] %s601_s10  ;;  %s1640_s11 = int_to_ptr.vmem [resolvable:$true] %s585_s11 }
  0x4b   : > { %956 = vpow2.f32 %v441_v15  ;;  %v445_v21 = vmul.f32 1.442695, %v439_v13  ;;  %v447_v27 = vmul.f32 1.442695, %v440_v14  ;;  %v847_v30 = vsel %vm349_vm1, 1.0, %v1222_v28  ;;  %s617_s27 = sshll.u32 %s1432_s30, 4  ;;  %s1647_s27 = int_to_ptr.vmem [resolvable:$true] %s617_s27 }
  0x4c   : > { %v367_v22 = vmul.f32 1.442695, %v363_v17  ;;  %v369_v23 = vmul.f32 1.442695, %v364_v18  ;;  %v371_v24 = vmul.f32 1.442695, %v365_v19  ;;  %958 = vpow2.f32 %v443_v16 }
  0x4d   : > { %v373_v26 = vmul.f32 1.442695, %v366_v20  ;;  %960 = vpow2.f32 %v445_v21  ;;  %v848_v31 = vsel %vm350_vm2, 1.0, %v1222_v28  ;;  %v849_v32 = vsel %vm351_vm3, 1.0, %v1222_v28  ;;  %430 = vst [vmem:[%s1432_s30 + $0x8] sm:$0xff] %v847_v30  ;;  %s1651_s28 = scalar_lea.sflag [#allocation9], %s561_s17 }
  0x4e   : > { %962 = vpow2.f32 %v367_v22  ;;  %431 = vst [vmem:[%s1432_s30 + $0x10] sm:$0xff] %v848_v31  ;;  %432 = vst [vmem:[%s1432_s30 + $0x18] sm:$0xff] %v849_v32  ;;  %vm501_vm4 = vcmp.ge.f32.partialorder %v1393_v0, 0.0  ;;  %v453_v51 = vsel %vm348_vm0, %v1393_v0, 0.0  ;;  %v450_v52 = vmax.f32 %v1395_v1, 0.0  ;;  %s1645_s30 = scalar_lea.hbm %s1774_s4, %s865_s13  ;;  %s1046_s14 = scalar_lea.vmem %s1633_s10, 512 }
  0x4f   : > { %964 = vpow2.f32 %v369_v23  ;;  %vm502_vm5 = vcmp.ge.f32.partialorder %v1395_v1, 0.0  ;;  %v454_v53 = vsel %vm349_vm1, %v1395_v1, 0.0  ;;  %v451_v54 = vmax.f32 %v1397_v2, 0.0  ;;  %vm1488_vm6 = vmxor %vm348_vm0, %vm501_vm4  ;;  %p1047_p8 = scmp.ne.s32.totalorder %s1633_s10, %s1046_s14 }
  0x50   : > { %966 = vpow2.f32 %v371_v24  ;;  %v455_v57 = vsel %vm350_vm2, %v1397_v2, 0.0  ;;  %v457_v60 = vsub.f32 %v449_v50, %v453_v51  ;;  %vm1498_vm7 = vmxor %vm349_vm1, %vm502_vm5  ;;  %v458_v1 = vsub.f32 %v450_v52, %v454_v53 }
  0x51   : > { %968 = vpow2.f32 %v373_v26  ;;  %vm503_vm8 = vcmp.ge.f32.partialorder %v1397_v2, 0.0  ;;  %vm504_vm9 = vcmp.ge.f32.partialorder %v1399_v3, 0.0  ;;  %vm1510_vm11 = vmxor %vm1488_vm6, %vm1223_vm10  ;;  %v1514_v8 = vsub.f32 %v451_v54, %v455_v57  ;;  %p1048_p0 = pnand %p1047_p8, %p1315_p9 }
  0x52   : > { %970 = vpow2.f32 %v447_v27  ;;  %v456_v9 = vsel %vm351_vm3, %v1399_v3, 0.0  ;;  %vm1523_vm12 = vmxor %vm1498_vm7, %vm1223_vm10  ;;  %v452_v31 = vmax.f32 %v1399_v3, 0.0 }
  0x53   : > { %vm1537_vm14 = vmxor %vm350_vm2, %vm503_vm8  ;;  %p1049_p2 = pneg %p1048_p0 }
  0x54   : > { %vm1557_vm4 = vmxor %vm1537_vm14, %vm1223_vm10  ;;  %v460_v6 = vsub.f32 %v452_v31, %v456_v9 }
  0x55   : > { %vm1572_vm6 = vmxor %vm351_vm3, %vm504_vm9  ;;  %vm386_vm9 = vcmp.ge.s32.totalorder %v1413_v25, 0 }
  0x56   : > { %vm1586_vm7 = vmxor %vm1572_vm6, %vm1223_vm10 }
  0x58   : > { %v1438_v33 = vpop.eup %956 }
  0x59   : > { %v1440_v34 = vpop.eup %958  ;;  %v461_v35 = vadd.f32 1.0, %v1438_v33  ;;  %v464_v48 = vmul.f32 -0.5, %v1438_v33  ;;  %v467_v58 = vand.u32 2147483647, %v1438_v33  ;;  %v513_v24 = vsel %vm1510_vm11, %v1438_v33, 1.0 }
  0x5a   : > { %v1443_v36 = vpop.eup %960  ;;  %v470_v37 = vadd.f32 1.0, %v1440_v34  ;;  %v473_v49 = vmul.f32 -0.5, %v1440_v34  ;;  %v476_v62 = vand.u32 2147483647, %v1440_v34  ;;  %v514_v30 = vsel %vm1523_vm12, %v1440_v34, 1.0 }
  0x5b   : > { %v1446_v38 = vpop.eup %962  ;;  %972 = vrcp.f32 %v461_v35  ;;  %v1455_v42 = vadd.f32 1.0, %v1443_v36  ;;  %v465_v55 = vadd.f32 1.0, %v464_v48  ;;  %v482_v63 = vmul.f32 -0.5, %v1443_v36 }
  0x5c   : > { %v1448_v39 = vpop.eup %964  ;;  %974 = vrcp.f32 %v470_v37  ;;  %v474_v59 = vadd.f32 1.0, %v473_v49  ;;  %vm1527_vm13 = vcmp.lt.f32.partialorder %v467_v58, 0.0004427343  ;;  %v485_v16 = vand.u32 2147483647, %v1443_v36 }
  0x5d   : > { %v1450_v40 = vpop.eup %966  ;;  %v375_v41 = vadd.f32 %v1448_v39, %v1446_v38  ;;  %976 = vlog2.f32 %v461_v35  ;;  %v466_v10 = vmul.f32 %v1438_v33, %v465_v55  ;;  %vm1541_vm15 = vcmp.lt.f32.partialorder %v476_v62, 0.0004427343 }
  0x5e   : > { %v1457_v43 = vpop.eup %968  ;;  %978 = vlog2.f32 %v470_v37  ;;  %v475_v15 = vmul.f32 %v1440_v34, %v474_v59  ;;  %v483_v22 = vadd.f32 1.0, %v482_v63  ;;  %vm1563_vm5 = vcmp.lt.f32.partialorder %v485_v16, 0.0004427343 }
  0x5f   : > { %v1459_v44 = vpop.eup %970  ;;  %v376_v45 = vadd.f32 %v1450_v40, %v375_v41  ;;  %980 = vlog2.f32 %v1455_v42 }
  0x60   : > { %v1464_v46 = vadd.f32 1.0, %v1459_v44  ;;  %982 = vrcp.f32 %v1455_v42  ;;  %v491_v4 = vmul.f32 -0.5, %v1459_v44  ;;  %v494_v34 = vand.u32 2147483647, %v1459_v44 }
  0x61   : > { %v1467_v47 = vadd.f32 %v1457_v43, %v376_v45  ;;  %v484_v52 = vmul.f32 %v1443_v36, %v483_v22 }
  0x62   : > { %984 = vlog2.f32 %v1464_v46  ;;  %v492_v2 = vadd.f32 1.0, %v491_v4  ;;  %vm1590_vm8 = vcmp.lt.f32.partialorder %v494_v34, 0.0004427343 }
  0x63   : > { %986 = vrcp.f32 %v1467_v47 }
  0x64   : > { %988 = vrcp.f32 %v1464_v46  ;;  %v493_v56 = vmul.f32 %v1459_v44, %v492_v2 }
  0x68   : > { %v973_v0 = vpop.eup %972 }
  0x69   : > { %v975_v5 = vpop.eup %974  ;;  %v525_v7 = vmul.f32 %v973_v0, %v461_v35 }
  0x6a   : > { %v977_v11 = vpop.eup %976  ;;  %v526_v13 = vmul.f32 %v975_v5, %v470_v37 }
  0x6b   : > { %v979_v17 = vpop.eup %978  ;;  %v529_v18 = vsub.f32 2.0, %v525_v7  ;;  %v463_v20 = vmul.f32 0.6931472, %v977_v11 }
  0x6c   : > { %v981_v23 = vpop.eup %980  ;;  %v530_v26 = vsub.f32 2.0, %v526_v13  ;;  %v472_v27 = vmul.f32 0.6931472, %v979_v17 }
  0x6d   : > { %v533_v29 = vmul.f32 %v973_v0, %v529_v18  ;;  %v469_v32 = vsel %vm1527_vm13, %v466_v10, %v463_v20  ;;  %v983_v35 = vpop.eup %982  ;;  %v481_v51 = vmul.f32 0.6931472, %v981_v23  ;;  %v515_v0 = vsel %vm1557_vm4, %v1443_v36, 1.0 }
  0x6e   : > { %v534_v37 = vmul.f32 %v975_v5, %v530_v26  ;;  %v478_v41 = vsel %vm1541_vm15, %v475_v15, %v472_v27  ;;  %v527_v53 = vmul.f32 %v983_v35, %v1455_v42  ;;  %v497_v57 = vadd.f32 %v469_v32, %v457_v60 }
  0x6f   : > { %v985_v48 = vpop.eup %984  ;;  %v537_v49 = vmul.f32 %v533_v29, %v513_v24  ;;  %v498_v58 = vadd.f32 %v478_v41, %v458_v1  ;;  %v487_v36 = vsel %vm1563_vm5, %v484_v52, %v481_v51  ;;  %v1605_v15 = vsel %vm386_vm9, 1.0, %v1222_v28 }
  0x70   : > { %v987_v54 = vpop.eup %986  ;;  %v538_v55 = vmul.f32 %v534_v37, %v514_v30  ;;  %v490_v61 = vmul.f32 0.6931472, %v985_v48  ;;  %v531_v62 = vsub.f32 2.0, %v527_v53  ;;  %v499_v9 = vadd.f32 %v487_v36, %v1514_v8 }
  0x71   : > { %v989_v59 = vpop.eup %988  ;;  %v379_v3 = vmul.f32 %v987_v54, %v1467_v47  ;;  %v541_v63 = vmul.f32 %v537_v49, %v537_v49 }
  0x72   : > { %v528_v47 = vmul.f32 %v989_v59, %v1464_v46  ;;  %v542_v1 = vmul.f32 %v538_v55, %v538_v55  ;;  %v535_v5 = vmul.f32 %v983_v35, %v531_v62  ;;  %v496_v13 = vsel %vm1590_vm8, %v493_v56, %v490_v61 }
  0x73   : > { %v380_v4 = vsub.f32 2.0, %v379_v3  ;;  %v545_v10 = vmul.f32 %v541_v63, %v497_v57  ;;  %v516_v46 = vsel %vm1586_vm7, %v1459_v44, 1.0  ;;  %v500_v21 = vadd.f32 %v496_v13, %v460_v6 }
  0x74   : > { %v532_v7 = vsub.f32 2.0, %v528_v47  ;;  %v546_v11 = vmul.f32 %v542_v1, %v498_v58  ;;  %v539_v14 = vmul.f32 %v535_v5, %v515_v0 }
  0x75   : > { %v381_v12 = vmul.f32 %v987_v54, %v380_v4 }
  0x76   : > { %v536_v16 = vmul.f32 %v989_v59, %v532_v7  ;;  %v543_v44 = vmul.f32 %v539_v14, %v539_v14  ;;  %v549_v23 = vadd.f32 %v546_v11, %v545_v10 }
  0x77   : > { %v382_v17 = vmul.f32 %v1446_v38, %v381_v12  ;;  %v383_v18 = vmul.f32 %v1448_v39, %v381_v12  ;;  %v384_v19 = vmul.f32 %v1450_v40, %v381_v12  ;;  %v385_v20 = vmul.f32 %v1457_v43, %v381_v12 }
  0x78   : > { %v540_v22 = vmul.f32 %v536_v16, %v516_v46  ;;  %v547_v27 = vmul.f32 %v543_v44, %v499_v9 }
  0x79   : > { %v389_v28 = vmul.f32 %v1605_v15, %v382_v17  ;;  %v390_v8 = vmul.f32 %v1605_v15, %v383_v18  ;;  %v391_v38 = vmul.f32 %v1605_v15, %v384_v19  ;;  %v392_v39 = vmul.f32 %v1605_v15, %v385_v20 }
  0x7a   : > { %v397_v40 = vsel %vm348_vm0, %v382_v17, 0.0  ;;  %v398_v43 = vsel %vm349_vm1, %v383_v18, 0.0  ;;  %v399_v24 = vsel %vm350_vm2, %v384_v19, 0.0  ;;  %v400_v26 = vsel %vm351_vm3, %v385_v20, 0.0 }
  0x7b   : > { %417 = vst [vmem:[%s311_s15] sm:$0xff] %v389_v28  ;;  %418 = vst [vmem:[%s311_s15 + $0x8] sm:$0xff] %v390_v8  ;;  %v544_v25 = vmul.f32 %v540_v22, %v540_v22 }
  0x7c   : > { %419 = vst [vmem:[%s311_s15 + $0x10] sm:$0xff] %v391_v38  ;;  %420 = vst [vmem:[%s311_s15 + $0x18] sm:$0xff] %v392_v39  ;;  %s1224_s15 = smov [#allocation8]  }
  0x7d   : > { %405 = vst [vmem:[%s304_s29] sm:$0xff] %v397_v40  ;;  %406 = vst [vmem:[%s304_s29 + $0x8] sm:$0xff] %v398_v43  ;;  %s1050_s9 = sshll.u32 %s1224_s15, 4  ;;  %s1051_s9 = int_to_ptr.vmem [resolvable:$false] %s1050_s9 }
  0x7e   : > { %407 = vst [vmem:[%s304_s29 + $0x10] sm:$0xff] %v399_v24  ;;  %408 = vst [vmem:[%s304_s29 + $0x18] sm:$0xff] %v400_v26  ;;  %s1052_s12 = scalar_lea.vmem %s1051_s9, 1024  ;;  %p1053_p5 = scmp.lt.s32.totalorder %s1633_s10, %s1051_s9 }
  0x7f   : > { %p1054_p6 = scmp.lt.s32.totalorder %s1052_s12, %s1046_s14 }
  0x81   : > { %p1055_p4 = por %p1054_p6, %p1053_p5 }
  0x83   : > { %p1056_p7 = pnand %p1055_p4, %p1049_p2 }
  0x85   : > { %1059 = shalt.err (!%p1056_p7)
}
  0x86   : > { %s1060_s24 = scalar_lea.hbm %s1630_s16, 512  ;;  %s1064_s29 = scalar_lea.hbm %s1773_s3, 1024 }
  0x87   : > { %p1061_p1 = scmp.ne.s32.totalorder %s1630_s16, %s1060_s24  ;;  %p1065_p3 = scmp.lt.s32.totalorder %s1630_s16, %s1773_s3 }
  0x88   : > { %p1066_p8 = scmp.lt.s32.totalorder %s1064_s29, %s1060_s24 }
  0x89   : > { %p1062_p10 = pnand %p1061_p1, %p1315_p9 }
  0x8a   : > { %p1067_p0 = por %p1066_p8, %p1065_p3 }
  0x8b   : > { %p1063_p13 = pneg %p1062_p10 }
  0x8d   : > { %p1068_p2 = pnand %p1067_p0, %p1063_p13 }
  0x8f   : > { %1071 = shalt.err (!%p1068_p2)
}
  0x90   : > { %s1225_s14 = smov 128   ;;  %s1226_s15 = smov 8   ;;  %v548_v2 = vmul.f32 %v544_v25, %v500_v21  ;;  %v550_v29 = vadd.f32 %v549_v23, %v547_v27 }
  0x91   : > { %873 = dma.vmem_to_hbm [thread:$0]  (%p1315_p9), %s1633_s10, 512, %s1630_s16, %s1651_s28, %s1225_s14, %s1225_s14, %s1226_s15  }
  0x92   : > { %s557_s9 = scalar_lea.sflag [#allocation4], %s1374_s0  ;;  %s1072_s12 = scalar_lea.vmem %s1640_s11, 512 }
  0x93   : > { %p1073_p5 = scmp.ne.s32.totalorder %s1640_s11, %s1072_s12  ;;  %s1227_s24 = smov [#allocation7]  }
  0x94   : > { %s1076_s17 = sshll.u32 %s1227_s24, 4  ;;  %s1077_s17 = int_to_ptr.vmem [resolvable:$false] %s1076_s17 }
  0x95   : > { %p1074_p6 = pnand %p1073_p5, %p1315_p9  ;;  %s1078_s13 = scalar_lea.vmem %s1077_s17, 1024 }
  0x96   : > { %p1079_p7 = scmp.lt.s32.totalorder %s1640_s11, %s1077_s17  ;;  %p1080_p1 = scmp.lt.s32.totalorder %s1078_s13, %s1072_s12 }
  0x97   : > { %p1075_p4 = pneg %p1074_p6 }
  0x98   : > { %p1081_p10 = por %p1080_p1, %p1079_p7 }
  0x9a   : > { %p1082_p13 = pnand %p1081_p10, %p1075_p4 }
  0x9c   : > { %1085 = shalt.err (!%p1082_p13)
}
  0x9d   : > { %s1086_s10 = scalar_lea.hbm %s1638_s20, 512  ;;  %s1090_s26 = scalar_lea.hbm %s1772_s2, 1024 }
  0x9e   : > { %p1087_p3 = scmp.ne.s32.totalorder %s1638_s20, %s1086_s10  ;;  %p1091_p2 = scmp.lt.s32.totalorder %s1638_s20, %s1772_s2 }
  0x9f   : > { %p1092_p5 = scmp.lt.s32.totalorder %s1090_s26, %s1086_s10 }
  0xa0   : > { %p1088_p8 = pnand %p1087_p3, %p1315_p9 }
  0xa1   : > { %p1093_p6 = por %p1092_p5, %p1091_p2 }
  0xa2   : > { %p1089_p0 = pneg %p1088_p8 }
  0xa4   : > { %p1094_p4 = pnand %p1093_p6, %p1089_p0 }
  0xa6   : > { %1097 = shalt.err (!%p1094_p4)
}
  0xa7   : > { %872 = dma.vmem_to_hbm [thread:$0]  (%p1315_p9), %s1640_s11, 512, %s1638_s20, %s557_s9, %s1225_s14, %s1225_s14, %s1226_s15  }
  0xa8   : > { %s1098_s12 = scalar_lea.vmem %s1647_s27, 512  ;;  %s1228_s17 = smov [#allocation10]  }
  0xa9   : > { %p1099_p7 = scmp.ne.s32.totalorder %s1647_s27, %s1098_s12  ;;  %s1102_s13 = sshll.u32 %s1228_s17, 4  ;;  %s1103_s13 = int_to_ptr.vmem [resolvable:$false] %s1102_s13 }
  0xaa   : > { %s1104_s10 = scalar_lea.vmem %s1103_s13, 1024  ;;  %p1105_p13 = scmp.lt.s32.totalorder %s1647_s27, %s1103_s13 }
  0xab   : > { %p1100_p1 = pnand %p1099_p7, %p1315_p9  ;;  %p1106_p3 = scmp.lt.s32.totalorder %s1104_s10, %s1098_s12 }
  0xad   : > { %p1101_p10 = pneg %p1100_p1  ;;  %p1107_p8 = por %p1106_p3, %p1105_p13 }
  0xaf   : > { %p1108_p0 = pnand %p1107_p8, %p1101_p10 }
  0xb1   : > { %1111 = shalt.err (!%p1108_p0)
}
  0xb2   : > { %s1112_s16 = scalar_lea.hbm %s1645_s30, 512  ;;  %s1116_s9 = scalar_lea.hbm %s1774_s4, 1024 }
  0xb3   : > { %p1113_p2 = scmp.ne.s32.totalorder %s1645_s30, %s1112_s16  ;;  %p1117_p4 = scmp.lt.s32.totalorder %s1645_s30, %s1774_s4 }
  0xb4   : > { %p1118_p7 = scmp.lt.s32.totalorder %s1116_s9, %s1112_s16 }
  0xb5   : > { %p1114_p5 = pnand %p1113_p2, %p1315_p9 }
  0xb6   : > { %p1119_p1 = por %p1118_p7, %p1117_p4 }
  0xb7   : > { %p1115_p6 = pneg %p1114_p5 }
  0xb9   : > { %p1120_p10 = pnand %p1119_p1, %p1115_p6 }
  0xbb   : > { %1123 = shalt.err (!%p1120_p10)
}
  0xbc   : > { %874 = dma.vmem_to_hbm [thread:$0]  (%p1315_p9), %s1647_s27, 512, %s1645_s30, %s1651_s28, %s1225_s14, %s1225_s14, %s1226_s15   ;;  %v551_v30 = vadd.f32 %v550_v29, %v548_v2 }
  0xbd   : > { %s861_s7 = sshll.u32 %s1208_s21, 7  ;;  %s325_s24 = scalar_lea.vmem [#allocation11], %s841_s25 }
  0xbe   : > { %s633_s12 = sshll.u32 %s325_s24, 4  ;;  %v552_v31 = vmul.f32 %v1605_v15, %v551_v30  ;;  %s631_s10 = scalar_lea.hbm %s1775_s5, %s861_s7  ;;  %s634_s12 = int_to_ptr.vmem [resolvable:$true] %s633_s12 }
  0xbf   : > { %s572_s16 = scalar_lea.sflag [#allocation12], %s1374_s0  ;;  %s1124_s11 = scalar_lea.vmem %s634_s12, 128 }
  0xc0   : > { %555 = vst [vmem:[%s325_s24] sm:$0xff] %v552_v31  ;;  %p1125_p13 = scmp.ne.s32.totalorder %s634_s12, %s1124_s11  ;;  %s1229_s27 = smov [#allocation11]  }
  0xc1   : > { %s1128_s30 = sshll.u32 %s1229_s27, 4  ;;  %s1129_s30 = int_to_ptr.vmem [resolvable:$false] %s1128_s30 }
  0xc2   : > { %p1126_p3 = pnand %p1125_p13, %p1315_p9  ;;  %s1130_s21 = scalar_lea.vmem %s1129_s30, 256 }
  0xc3   : > { %p1131_p0 = scmp.lt.s32.totalorder %s634_s12, %s1129_s30  ;;  %p1132_p2 = scmp.lt.s32.totalorder %s1130_s21, %s1124_s11 }
  0xc4   : > { %p1127_p8 = pneg %p1126_p3 }
  0xc5   : > { %p1133_p5 = por %p1132_p2, %p1131_p0 }
  0xc7   : > { %p1134_p6 = pnand %p1133_p5, %p1127_p8 }
  0xc9   : > { %1137 = shalt.err (!%p1134_p6)
}
  0xca   : > { %s1138_s25 = scalar_lea.hbm %s631_s10, 128  ;;  %s1142_s14 = scalar_lea.hbm %s1775_s5, 256 }
  0xcb   : > { %p1139_p4 = scmp.ne.s32.totalorder %s631_s10, %s1138_s25  ;;  %p1143_p10 = scmp.lt.s32.totalorder %s631_s10, %s1775_s5 }
  0xcc   : > { %p1144_p13 = scmp.lt.s32.totalorder %s1142_s14, %s1138_s25 }
  0xcd   : > { %p1140_p7 = pnand %p1139_p4, %p1315_p9 }
  0xce   : > { %p1145_p3 = por %p1144_p13, %p1143_p10 }
  0xcf   : > { %p1141_p1 = pneg %p1140_p7 }
  0xd1   : > { %p1146_p12 = pnand %p1145_p3, %p1141_p1 }
  0xd3   : > { %1149 = shalt.err (!%p1146_p12)
}
  0xd4   : > { %875 = dma.vmem_to_hbm [thread:$0]  (%p1315_p9), %s634_s12, 128, %s631_s10, %s572_s16  }
  0xd5 PF: > { %s645_s9 = sand.u32 1, %s1196_s18   ;;  %p1814_p8 = scmp.ge.s32.totalorder %s1216_s23, 2 }
  0xd6   : > { %s646_s29 = scalar_lea.sflag [#allocation4], %s645_s9 }
  0xd7   : > { %p888_p0 = pnand %p1814_p8, %p1324_p11 }
  0xd9   : > { %p889_p2 = pneg %p888_p0 }
  0xdb   : > { %1183 = dma.done.wait (%p889_p2), %s646_s29, 512  }
  0xdc   : > { %1185 = vsyncadd (%p889_p2), %s646_s29, 4294966784  ;;  %s1815_s26 = sadd.s32 4294967294, %s1216_s23  }
  0xdd   : > { %s654_s7 = sand.u32 1, %s1815_s26  }
  0xde   : > { %s655_s24 = scalar_lea.sflag [#allocation9], %s654_s7 }
  0xdf   : > { %1187 = dma.done.wait (%p889_p2), %s655_s24, 1024  }
  0xe0   : > { %1189 = vsyncadd (%p889_p2), %s655_s24, 4294966272  ;;  %s673_s6 = scalar_lea.sflag [#allocation12], %s645_s9 }
  0xe1   : > { %1191 = dma.done.wait (%p889_p2), %s673_s6, 128  }
  0xe2   : > { %1193 = vsyncadd (%p889_p2), %s673_s6, 4294967168  ;;  %s31_s23 = sadd.s32 1, %s1216_s23   ;;  %s1816_s8 = sld [smem:[#allocation18_spill]] }
  0xe3   : > { %p28_p9 = scmp.ge.s32.totalorder %s31_s23, 4   ;;  %s1817_s20 = sld [smem:[#allocation20_spill]] }
  0xe4   : > { %s1818_s12 = sld [smem:[#allocation19_spill]]  ;;  %s1819_s18 = smov %s1200_s19 }
  0xe5   : > { %s1821_s21 = smov %s1212_s22 }
  0xe6   :  { %30 = sbr.rel (!%p28_p9) target bundleno = 14 (0xe), region = 139 }
  0xe8   : > { %s1820_s19 = smov %s1816_s8 }
  0xea   : > { %s1822_s22 = smov %s1818_s12 }
  0xeb   :  { %678 = vsyncpa [#allocation3], 1 }
  0xec   :  { %680 = vsyncpa [#allocation3 + $0x1], 1 }
  0xed   :  { %681 = vsyncpa [#allocation6], 1 }
  0xee   :  { %683 = vsyncpa [#allocation6 + $0x1], 1 }
  0xef   :  { %684 = vsyncpa [#allocation4], 1 }
  0xf0   :  { %686 = vsyncpa [#allocation4 + $0x1], 1 }
  0xf1   :  { %687 = vsyncpa [#allocation9], 1 }
  0xf2   :  { %689 = vsyncpa [#allocation9 + $0x1], 1 }
  0xf3   :  { %690 = vsyncpa [#allocation12], 1 }
  0xf4   :  { %692 = vsyncpa [#allocation12 + $0x1], 1 }

</bundles_post_ra>
